<compile_context>
chip_gen: v6e
topology: v6e:2x2x1
jax: 0.10.0
libtpu: 0.0.40
codegen_flags: <defaults>
</compile_context>

<pallas_src>
import jax
import jax.numpy as jnp
from jax.experimental import pallas as pl
from jax.experimental.pallas import tpu as pltpu

_ROWS = 8
_COLS = 5000
_LANE = 128
_LANE_DENSE_COLS = 16000  # 128 * 125; divides n*8*5000 whenever n is even.


def _copy_kernel(x_ref, o_ref):
    # Identity copy of one (block_rows, cols) tile.  The reshape is metadata;
    # this kernel only materializes the data movement HBM->VMEM->HBM.
    o_ref[...] = x_ref[...]


def _cdiv(a, b):
    return -(-a // b)


def _chip_plan():
    """Return (target_block_bytes, vmem_limit_bytes) per TPU generation."""
    # Conservative default: works on v5e / v6e / v7x.
    target, limit = 4 << 20, 40 << 20
    try:
        vmem = getattr(pltpu.get_tpu_info(), "vmem_capacity_bytes", None)
        if vmem is not None and vmem <= (80 << 20):
            # v7x: 64 MiB physical VMEM, ~3.2 TB/s HBM.  Bigger blocks amortize
            # the ~0.35 us/step overhead; the 32 MiB default scoped limit must
            # be raised explicitly (4 x 8 MiB pipeline buffers + scratch).
            target, limit = 8 << 20, 48 << 20
    except Exception:
        pass
    return target, limit


def _choose_block_rows(rows, padded_row_bytes, align, target_bytes):
    """Pick block_rows: big (near target_bytes), sublane-aligned, >=2 grid steps."""
    if rows < 2 * align:
        # Too small to split on aligned boundaries: one full-extent block
        # (block dim == full array dim is always legal).
        return rows
    br = max(align, (target_bytes // padded_row_bytes) // align * align)
    # Cap so the grid has at least 2 steps (keeps both v7x TensorCores busy).
    two_step_cap = _cdiv(_cdiv(rows, 2), align) * align
    return min(br, two_step_cap)


def reshape_for_fcn(x):
    """Equivalent of torch `x.view(-1, 8, 5000)` with the copy done in Pallas.

    If a caller can legally consume the reshaped *view*, prefer
    `jnp.reshape(x, (-1, 8, 5000))` directly (zero cost); this function is the
    materialized-copy path.
    """
    total = x.size
    assert total % (_ROWS * _COLS) == 0, (
        f"input with {total} elements cannot be viewed as (-1, {_ROWS}, {_COLS})"
    )
    n = total // (_ROWS * _COLS)
    itemsize = jnp.dtype(x.dtype).itemsize

    # Row-major 2D presentation of the same flat data (matches torch.view
    # semantics on a contiguous tensor).  Prefer a lane-dense column count
    # (multiple of 128) when it divides the flat size; otherwise 5000 (full
    # row extent is always a legal block last-dim, padded to 5120 lanes).
    cols = _LANE_DENSE_COLS if total % _LANE_DENSE_COLS == 0 else _COLS
    rows = total // cols
    x2d = jnp.reshape(x, (rows, cols))

    # Sublane min-tile per dtype: f32 -> 8, bf16 -> 16, int8/fp8 -> 32.
    align = max(8, 32 // itemsize)
    padded_row_bytes = _cdiv(cols, _LANE) * _LANE * itemsize
    target_bytes, vmem_limit = _chip_plan()
    block_rows = _choose_block_rows(rows, padded_row_bytes, align, target_bytes)
    grid = (_cdiv(rows, block_rows),)  # partial last block is masked by Pallas

    out2d = pl.pallas_call(
        _copy_kernel,
        out_shape=jax.ShapeDtypeStruct((rows, cols), x.dtype),
        grid=grid,
        in_specs=[pl.BlockSpec((block_rows, cols), lambda i: (i, 0))],
        out_specs=pl.BlockSpec((block_rows, cols), lambda i: (i, 0)),
        compiler_params=pltpu.CompilerParams(
            dimension_semantics=("parallel",),
            vmem_limit_bytes=vmem_limit,
        ),
        cost_estimate=pl.CostEstimate(
            flops=0,
            transcendentals=0,
            bytes_accessed=2 * total * itemsize,
        ),
    )(x2d)

    return jnp.reshape(out2d, (n, _ROWS, _COLS))


if __name__ == "__main__":
    key = jax.random.PRNGKey(0)
    k1, k2 = jax.random.split(key)

    # Case 1: 2 * 4 * 10000 = 80000 elements -> view(-1, 8, 5000) = (2, 8, 5000).
    # Even n -> lane-dense cols=16000 path.
    x1 = jax.random.normal(k1, (2, 4, 10000), dtype=jnp.float32)
    y1 = reshape_for_fcn(x1)
    jax.block_until_ready(y1)
    y1_ref = jnp.reshape(x1, (-1, _ROWS, _COLS))
    assert y1.shape == (2, _ROWS, _COLS), y1.shape
    assert y1.dtype == x1.dtype
    assert bool(jnp.array_equal(y1, y1_ref))

    # Case 2: odd n -> cols=5000 path, multi-step grid with a masked partial
    # last block (rows=24, block_rows=16 -> grid=(2,)).
    x2 = jax.random.normal(k2, (3, 8, 5000), dtype=jnp.float32)
    y2 = reshape_for_fcn(x2)
    jax.block_until_ready(y2)
    y2_ref = jnp.reshape(x2, (-1, _ROWS, _COLS))
    assert y2.shape == (3, _ROWS, _COLS), y2.shape
    assert bool(jnp.array_equal(y2, y2_ref))

    print("KERNEL_OK")
</pallas_src>

<mosaic_0001>
module attributes {stable_mosaic.version = 11 : i64} {
  func.func @_copy_kernel(%arg0: i32, %arg1: memref<5x16000xf32, #tpu.memory_space<vmem>>, %arg2: memref<5x16000xf32, #tpu.memory_space<vmem>>) attributes {dimension_semantics = [#tpu.dimension_semantics<parallel>], iteration_bounds = array<i64: 1>, scalar_prefetch = 0 : i64, scratch_operands = 0 : i64, tpu.core_type = #tpu.core_type<tc>, window_params = [{transform_indices = @transform_0, window_bounds = array<i64: 5, 16000>}, {transform_indices = @transform_1, window_bounds = array<i64: 5, 16000>}]} {
    %c0 = arith.constant 0 : index
    %c0_0 = arith.constant 0 : index
    %0 = vector.load %arg1[%c0, %c0_0] : memref<5x16000xf32, #tpu.memory_space<vmem>>, vector<5x16000xf32>
    %c0_1 = arith.constant 0 : index
    %c0_2 = arith.constant 0 : index
    %1 = vector.load %arg2[%c0_1, %c0_2] : memref<5x16000xf32, #tpu.memory_space<vmem>>, vector<5x16000xf32>
    tpu.vector_store %arg2[%c0_1, %c0_2], %0 {strides = array<i32>} : memref<5x16000xf32, #tpu.memory_space<vmem>>, vector<5x16000xf32>,
    return
  }
  func.func @transform_0(%arg0: i32) -> (i32, i32) {
    %c0_i32 = arith.constant 0 : i32
    %c0_i32_0 = arith.constant 0 : i32
    return %arg0, %c0_i32 : i32, i32
  }
  func.func @transform_1(%arg0: i32) -> (i32, i32) {
    %c0_i32 = arith.constant 0 : i32
    %c0_i32_0 = arith.constant 0 : i32
    return %arg0, %c0_i32 : i32, i32
  }
}

</mosaic_0001>

<bundles_post_ra>
// kernel: tpu_custom_call.1
= control target key start
LH: loop header
LB: loop body
LE: loop exit
PB: predicated region body
PF: predicated region fallthrough
CT: control target
= control target key end

     0   :  { %6 = vsyncpa [#allocation3], 0  ;;  %s353_s0 = inlined_call_operand.hbm [shape: f32[5,16000], index: 0, kind: input, shape index: {}]   ;;  %s354_s1 = inlined_call_operand.hbm [shape: f32[5,16000], index: 1, kind: output, shape index: {}]  }
   0x1   :  { %7 = vsyncpa [#allocation4], 0  ;;  %s332_s6 = smov [#allocation2]  }
   0x2   :  { %s14_s7 = sshll.u32 %s332_s6, 4  ;;  %s15_s7 = int_to_ptr.vmem [resolvable:$true] %s14_s7 }
   0x3   :  { %s296_s8 = scalar_lea.vmem %s15_s7, 16000  ;;  %p301_p1 = scmp.lt.s32.totalorder %s15_s7, %s15_s7 }
   0x4   :  { %p297_p0 = scmp.ne.s32.totalorder %s15_s7, %s296_s8  ;;  %p302_p2 = scmp.lt.s32.totalorder %s296_s8, %s296_s8 }
   0x6   :  { %p303_p3 = por %p302_p2, %p301_p1 }
   0x8   :  { %p304_p4 = pnand %p303_p3, %p297_p0 }
   0xa   :  { %307 = shalt.err (!%p304_p4)
}
   0xb   :  { %17 = dma.hbm_to_vmem [thread:$0]  %s353_s0, 16000, %s15_s7, [#allocation3]  }
   0xc   :  { %328 = dma.done.wait [#allocation3], 16000  }
   0xd   :  { %329 = vsyncadd [#allocation3], 4294951296  ;;  %s333_s11 = smov [#allocation5]   ;;  %v21_v0 = vld [vmem:[#allocation2] sm:$0x1f] }
   0xe   :  { %s347_s12 = sshll.u32 %s333_s11, 4  ;;  %v22_v1 = vld [vmem:[#allocation2 + $0x8] sm:$0x1f]  ;;  %v23_v2 = vld [vmem:[#allocation2 + $0x10] sm:$0x1f]  ;;  %s278_s12 = int_to_ptr.vmem [resolvable:$true] %s347_s12 }
   0xf   :  { %146 = vst [vmem:[#allocation5] sm:$0x1f] %v21_v0  ;;  %147 = vst [vmem:[#allocation5 + $0x8] sm:$0x1f] %v22_v1  ;;  %v24_v3 = vld [vmem:[#allocation2 + $0x18] sm:$0x1f]  ;;  %p313_p6 = scmp.lt.s32.totalorder %s278_s12, %s278_s12 }
  0x10   :  { %148 = vst [vmem:[#allocation5 + $0x10] sm:$0x1f] %v23_v2  ;;  %v25_v4 = vld [vmem:[#allocation2 + $0x20] sm:$0x1f]  ;;  %v26_v5 = vld [vmem:[#allocation2 + $0x28] sm:$0x1f] }
  0x11   :  { %149 = vst [vmem:[#allocation5 + $0x18] sm:$0x1f] %v24_v3  ;;  %150 = vst [vmem:[#allocation5 + $0x20] sm:$0x1f] %v25_v4  ;;  %v27_v6 = vld [vmem:[#allocation2 + $0x30] sm:$0x1f] }
  0x12   :  { %151 = vst [vmem:[#allocation5 + $0x28] sm:$0x1f] %v26_v5  ;;  %v28_v7 = vld [vmem:[#allocation2 + $0x38] sm:$0x1f]  ;;  %v29_v8 = vld [vmem:[#allocation2 + $0x40] sm:$0x1f] }
  0x13   :  { %152 = vst [vmem:[#allocation5 + $0x30] sm:$0x1f] %v27_v6  ;;  %153 = vst [vmem:[#allocation5 + $0x38] sm:$0x1f] %v28_v7  ;;  %v30_v9 = vld [vmem:[#allocation2 + $0x48] sm:$0x1f] }
  0x14   :  { %154 = vst [vmem:[#allocation5 + $0x40] sm:$0x1f] %v29_v8  ;;  %v31_v10 = vld [vmem:[#allocation2 + $0x50] sm:$0x1f]  ;;  %v32_v11 = vld [vmem:[#allocation2 + $0x58] sm:$0x1f] }
  0x15   :  { %155 = vst [vmem:[#allocation5 + $0x48] sm:$0x1f] %v30_v9  ;;  %156 = vst [vmem:[#allocation5 + $0x50] sm:$0x1f] %v31_v10  ;;  %v33_v12 = vld [vmem:[#allocation2 + $0x60] sm:$0x1f] }
  0x16   :  { %157 = vst [vmem:[#allocation5 + $0x58] sm:$0x1f] %v32_v11  ;;  %v34_v13 = vld [vmem:[#allocation2 + $0x68] sm:$0x1f]  ;;  %v35_v14 = vld [vmem:[#allocation2 + $0x70] sm:$0x1f] }
  0x17   :  { %158 = vst [vmem:[#allocation5 + $0x60] sm:$0x1f] %v33_v12  ;;  %159 = vst [vmem:[#allocation5 + $0x68] sm:$0x1f] %v34_v13  ;;  %v36_v15 = vld [vmem:[#allocation2 + $0x78] sm:$0x1f] }
  0x18   :  { %160 = vst [vmem:[#allocation5 + $0x70] sm:$0x1f] %v35_v14  ;;  %v37_v16 = vld [vmem:[#allocation2 + $0x80] sm:$0x1f]  ;;  %v38_v17 = vld [vmem:[#allocation2 + $0x88] sm:$0x1f] }
  0x19   :  { %161 = vst [vmem:[#allocation5 + $0x78] sm:$0x1f] %v36_v15  ;;  %162 = vst [vmem:[#allocation5 + $0x80] sm:$0x1f] %v37_v16  ;;  %v39_v18 = vld [vmem:[#allocation2 + $0x90] sm:$0x1f] }
  0x1a   :  { %163 = vst [vmem:[#allocation5 + $0x88] sm:$0x1f] %v38_v17  ;;  %v40_v19 = vld [vmem:[#allocation2 + $0x98] sm:$0x1f]  ;;  %v41_v20 = vld [vmem:[#allocation2 + $0xa0] sm:$0x1f] }
  0x1b   :  { %164 = vst [vmem:[#allocation5 + $0x90] sm:$0x1f] %v39_v18  ;;  %165 = vst [vmem:[#allocation5 + $0x98] sm:$0x1f] %v40_v19  ;;  %v42_v21 = vld [vmem:[#allocation2 + $0xa8] sm:$0x1f] }
  0x1c   :  { %166 = vst [vmem:[#allocation5 + $0xa0] sm:$0x1f] %v41_v20  ;;  %v43_v22 = vld [vmem:[#allocation2 + $0xb0] sm:$0x1f]  ;;  %v44_v23 = vld [vmem:[#allocation2 + $0xb8] sm:$0x1f] }
  0x1d   :  { %167 = vst [vmem:[#allocation5 + $0xa8] sm:$0x1f] %v42_v21  ;;  %168 = vst [vmem:[#allocation5 + $0xb0] sm:$0x1f] %v43_v22  ;;  %v45_v24 = vld [vmem:[#allocation2 + $0xc0] sm:$0x1f] }
  0x1e   :  { %169 = vst [vmem:[#allocation5 + $0xb8] sm:$0x1f] %v44_v23  ;;  %v46_v25 = vld [vmem:[#allocation2 + $0xc8] sm:$0x1f]  ;;  %v47_v26 = vld [vmem:[#allocation2 + $0xd0] sm:$0x1f] }
  0x1f   :  { %170 = vst [vmem:[#allocation5 + $0xc0] sm:$0x1f] %v45_v24  ;;  %171 = vst [vmem:[#allocation5 + $0xc8] sm:$0x1f] %v46_v25  ;;  %v48_v27 = vld [vmem:[#allocation2 + $0xd8] sm:$0x1f] }
  0x20   :  { %172 = vst [vmem:[#allocation5 + $0xd0] sm:$0x1f] %v47_v26  ;;  %v49_v28 = vld [vmem:[#allocation2 + $0xe0] sm:$0x1f]  ;;  %v50_v29 = vld [vmem:[#allocation2 + $0xe8] sm:$0x1f] }
  0x21   :  { %173 = vst [vmem:[#allocation5 + $0xd8] sm:$0x1f] %v48_v27  ;;  %174 = vst [vmem:[#allocation5 + $0xe0] sm:$0x1f] %v49_v28  ;;  %v51_v30 = vld [vmem:[#allocation2 + $0xf0] sm:$0x1f] }
  0x22   :  { %175 = vst [vmem:[#allocation5 + $0xe8] sm:$0x1f] %v50_v29  ;;  %v52_v31 = vld [vmem:[#allocation2 + $0xf8] sm:$0x1f]  ;;  %v53_v32 = vld [vmem:[#allocation2 + $0x100] sm:$0x1f] }
  0x23   :  { %176 = vst [vmem:[#allocation5 + $0xf0] sm:$0x1f] %v51_v30  ;;  %177 = vst [vmem:[#allocation5 + $0xf8] sm:$0x1f] %v52_v31  ;;  %v54_v33 = vld [vmem:[#allocation2 + $0x108] sm:$0x1f] }
  0x24   :  { %178 = vst [vmem:[#allocation5 + $0x100] sm:$0x1f] %v53_v32  ;;  %v55_v34 = vld [vmem:[#allocation2 + $0x110] sm:$0x1f]  ;;  %v56_v35 = vld [vmem:[#allocation2 + $0x118] sm:$0x1f] }
  0x25   :  { %179 = vst [vmem:[#allocation5 + $0x108] sm:$0x1f] %v54_v33  ;;  %180 = vst [vmem:[#allocation5 + $0x110] sm:$0x1f] %v55_v34  ;;  %v57_v36 = vld [vmem:[#allocation2 + $0x120] sm:$0x1f] }
  0x26   :  { %181 = vst [vmem:[#allocation5 + $0x118] sm:$0x1f] %v56_v35  ;;  %v58_v37 = vld [vmem:[#allocation2 + $0x128] sm:$0x1f]  ;;  %v59_v38 = vld [vmem:[#allocation2 + $0x130] sm:$0x1f] }
  0x27   :  { %182 = vst [vmem:[#allocation5 + $0x120] sm:$0x1f] %v57_v36  ;;  %183 = vst [vmem:[#allocation5 + $0x128] sm:$0x1f] %v58_v37  ;;  %v60_v39 = vld [vmem:[#allocation2 + $0x138] sm:$0x1f] }
  0x28   :  { %184 = vst [vmem:[#allocation5 + $0x130] sm:$0x1f] %v59_v38  ;;  %v61_v40 = vld [vmem:[#allocation2 + $0x140] sm:$0x1f]  ;;  %v62_v41 = vld [vmem:[#allocation2 + $0x148] sm:$0x1f] }
  0x29   :  { %185 = vst [vmem:[#allocation5 + $0x138] sm:$0x1f] %v60_v39  ;;  %186 = vst [vmem:[#allocation5 + $0x140] sm:$0x1f] %v61_v40  ;;  %v63_v42 = vld [vmem:[#allocation2 + $0x150] sm:$0x1f] }
  0x2a   :  { %187 = vst [vmem:[#allocation5 + $0x148] sm:$0x1f] %v62_v41  ;;  %v64_v43 = vld [vmem:[#allocation2 + $0x158] sm:$0x1f]  ;;  %v65_v44 = vld [vmem:[#allocation2 + $0x160] sm:$0x1f] }
  0x2b   :  { %188 = vst [vmem:[#allocation5 + $0x150] sm:$0x1f] %v63_v42  ;;  %189 = vst [vmem:[#allocation5 + $0x158] sm:$0x1f] %v64_v43  ;;  %v66_v45 = vld [vmem:[#allocation2 + $0x168] sm:$0x1f] }
  0x2c   :  { %190 = vst [vmem:[#allocation5 + $0x160] sm:$0x1f] %v65_v44  ;;  %v67_v46 = vld [vmem:[#allocation2 + $0x170] sm:$0x1f]  ;;  %v68_v47 = vld [vmem:[#allocation2 + $0x178] sm:$0x1f] }
  0x2d   :  { %191 = vst [vmem:[#allocation5 + $0x168] sm:$0x1f] %v66_v45  ;;  %192 = vst [vmem:[#allocation5 + $0x170] sm:$0x1f] %v67_v46  ;;  %v69_v48 = vld [vmem:[#allocation2 + $0x180] sm:$0x1f] }
  0x2e   :  { %193 = vst [vmem:[#allocation5 + $0x178] sm:$0x1f] %v68_v47  ;;  %v70_v49 = vld [vmem:[#allocation2 + $0x188] sm:$0x1f]  ;;  %v71_v50 = vld [vmem:[#allocation2 + $0x190] sm:$0x1f] }
  0x2f   :  { %194 = vst [vmem:[#allocation5 + $0x180] sm:$0x1f] %v69_v48  ;;  %195 = vst [vmem:[#allocation5 + $0x188] sm:$0x1f] %v70_v49  ;;  %v72_v51 = vld [vmem:[#allocation2 + $0x198] sm:$0x1f] }
  0x30   :  { %196 = vst [vmem:[#allocation5 + $0x190] sm:$0x1f] %v71_v50  ;;  %v73_v52 = vld [vmem:[#allocation2 + $0x1a0] sm:$0x1f]  ;;  %v74_v53 = vld [vmem:[#allocation2 + $0x1a8] sm:$0x1f] }
  0x31   :  { %197 = vst [vmem:[#allocation5 + $0x198] sm:$0x1f] %v72_v51  ;;  %198 = vst [vmem:[#allocation5 + $0x1a0] sm:$0x1f] %v73_v52  ;;  %v75_v54 = vld [vmem:[#allocation2 + $0x1b0] sm:$0x1f] }
  0x32   :  { %199 = vst [vmem:[#allocation5 + $0x1a8] sm:$0x1f] %v74_v53  ;;  %v76_v55 = vld [vmem:[#allocation2 + $0x1b8] sm:$0x1f]  ;;  %v77_v56 = vld [vmem:[#allocation2 + $0x1c0] sm:$0x1f] }
  0x33   :  { %200 = vst [vmem:[#allocation5 + $0x1b0] sm:$0x1f] %v75_v54  ;;  %201 = vst [vmem:[#allocation5 + $0x1b8] sm:$0x1f] %v76_v55  ;;  %v78_v57 = vld [vmem:[#allocation2 + $0x1c8] sm:$0x1f] }
  0x34   :  { %202 = vst [vmem:[#allocation5 + $0x1c0] sm:$0x1f] %v77_v56  ;;  %v79_v58 = vld [vmem:[#allocation2 + $0x1d0] sm:$0x1f]  ;;  %v80_v59 = vld [vmem:[#allocation2 + $0x1d8] sm:$0x1f] }
  0x35   :  { %203 = vst [vmem:[#allocation5 + $0x1c8] sm:$0x1f] %v78_v57  ;;  %204 = vst [vmem:[#allocation5 + $0x1d0] sm:$0x1f] %v79_v58  ;;  %v81_v60 = vld [vmem:[#allocation2 + $0x1e0] sm:$0x1f] }
  0x36   :  { %205 = vst [vmem:[#allocation5 + $0x1d8] sm:$0x1f] %v80_v59  ;;  %v82_v61 = vld [vmem:[#allocation2 + $0x1e8] sm:$0x1f]  ;;  %v83_v62 = vld [vmem:[#allocation2 + $0x1f0] sm:$0x1f] }
  0x37   :  { %206 = vst [vmem:[#allocation5 + $0x1e0] sm:$0x1f] %v81_v60  ;;  %207 = vst [vmem:[#allocation5 + $0x1e8] sm:$0x1f] %v82_v61  ;;  %v84_v63 = vld [vmem:[#allocation2 + $0x1f8] sm:$0x1f] }
  0x38   :  { %208 = vst [vmem:[#allocation5 + $0x1f0] sm:$0x1f] %v83_v62  ;;  %v85_v0 = vld [vmem:[#allocation2 + $0x200] sm:$0x1f]  ;;  %v86_v1 = vld [vmem:[#allocation2 + $0x208] sm:$0x1f] }
  0x39   :  { %209 = vst [vmem:[#allocation5 + $0x1f8] sm:$0x1f] %v84_v63  ;;  %210 = vst [vmem:[#allocation5 + $0x200] sm:$0x1f] %v85_v0  ;;  %v87_v2 = vld [vmem:[#allocation2 + $0x210] sm:$0x1f] }
  0x3a   :  { %211 = vst [vmem:[#allocation5 + $0x208] sm:$0x1f] %v86_v1  ;;  %v88_v3 = vld [vmem:[#allocation2 + $0x218] sm:$0x1f]  ;;  %v89_v4 = vld [vmem:[#allocation2 + $0x220] sm:$0x1f] }
  0x3b   :  { %212 = vst [vmem:[#allocation5 + $0x210] sm:$0x1f] %v87_v2  ;;  %213 = vst [vmem:[#allocation5 + $0x218] sm:$0x1f] %v88_v3  ;;  %v90_v5 = vld [vmem:[#allocation2 + $0x228] sm:$0x1f] }
  0x3c   :  { %214 = vst [vmem:[#allocation5 + $0x220] sm:$0x1f] %v89_v4  ;;  %v91_v6 = vld [vmem:[#allocation2 + $0x230] sm:$0x1f]  ;;  %v92_v7 = vld [vmem:[#allocation2 + $0x238] sm:$0x1f] }
  0x3d   :  { %215 = vst [vmem:[#allocation5 + $0x228] sm:$0x1f] %v90_v5  ;;  %216 = vst [vmem:[#allocation5 + $0x230] sm:$0x1f] %v91_v6  ;;  %v93_v8 = vld [vmem:[#allocation2 + $0x240] sm:$0x1f] }
  0x3e   :  { %217 = vst [vmem:[#allocation5 + $0x238] sm:$0x1f] %v92_v7  ;;  %v94_v9 = vld [vmem:[#allocation2 + $0x248] sm:$0x1f]  ;;  %v95_v10 = vld [vmem:[#allocation2 + $0x250] sm:$0x1f] }
  0x3f   :  { %218 = vst [vmem:[#allocation5 + $0x240] sm:$0x1f] %v93_v8  ;;  %219 = vst [vmem:[#allocation5 + $0x248] sm:$0x1f] %v94_v9  ;;  %v96_v11 = vld [vmem:[#allocation2 + $0x258] sm:$0x1f] }
  0x40   :  { %220 = vst [vmem:[#allocation5 + $0x250] sm:$0x1f] %v95_v10  ;;  %v97_v12 = vld [vmem:[#allocation2 + $0x260] sm:$0x1f]  ;;  %v98_v13 = vld [vmem:[#allocation2 + $0x268] sm:$0x1f] }
  0x41   :  { %221 = vst [vmem:[#allocation5 + $0x258] sm:$0x1f] %v96_v11  ;;  %222 = vst [vmem:[#allocation5 + $0x260] sm:$0x1f] %v97_v12  ;;  %v99_v14 = vld [vmem:[#allocation2 + $0x270] sm:$0x1f] }
  0x42   :  { %223 = vst [vmem:[#allocation5 + $0x268] sm:$0x1f] %v98_v13  ;;  %v100_v15 = vld [vmem:[#allocation2 + $0x278] sm:$0x1f]  ;;  %v101_v16 = vld [vmem:[#allocation2 + $0x280] sm:$0x1f] }
  0x43   :  { %224 = vst [vmem:[#allocation5 + $0x270] sm:$0x1f] %v99_v14  ;;  %225 = vst [vmem:[#allocation5 + $0x278] sm:$0x1f] %v100_v15  ;;  %v102_v17 = vld [vmem:[#allocation2 + $0x288] sm:$0x1f] }
  0x44   :  { %226 = vst [vmem:[#allocation5 + $0x280] sm:$0x1f] %v101_v16  ;;  %v103_v18 = vld [vmem:[#allocation2 + $0x290] sm:$0x1f]  ;;  %v104_v19 = vld [vmem:[#allocation2 + $0x298] sm:$0x1f] }
  0x45   :  { %227 = vst [vmem:[#allocation5 + $0x288] sm:$0x1f] %v102_v17  ;;  %228 = vst [vmem:[#allocation5 + $0x290] sm:$0x1f] %v103_v18  ;;  %v105_v20 = vld [vmem:[#allocation2 + $0x2a0] sm:$0x1f] }
  0x46   :  { %229 = vst [vmem:[#allocation5 + $0x298] sm:$0x1f] %v104_v19  ;;  %v106_v21 = vld [vmem:[#allocation2 + $0x2a8] sm:$0x1f]  ;;  %v107_v22 = vld [vmem:[#allocation2 + $0x2b0] sm:$0x1f] }
  0x47   :  { %230 = vst [vmem:[#allocation5 + $0x2a0] sm:$0x1f] %v105_v20  ;;  %231 = vst [vmem:[#allocation5 + $0x2a8] sm:$0x1f] %v106_v21  ;;  %v108_v23 = vld [vmem:[#allocation2 + $0x2b8] sm:$0x1f] }
  0x48   :  { %232 = vst [vmem:[#allocation5 + $0x2b0] sm:$0x1f] %v107_v22  ;;  %v109_v24 = vld [vmem:[#allocation2 + $0x2c0] sm:$0x1f]  ;;  %v110_v25 = vld [vmem:[#allocation2 + $0x2c8] sm:$0x1f] }
  0x49   :  { %233 = vst [vmem:[#allocation5 + $0x2b8] sm:$0x1f] %v108_v23  ;;  %234 = vst [vmem:[#allocation5 + $0x2c0] sm:$0x1f] %v109_v24  ;;  %v111_v26 = vld [vmem:[#allocation2 + $0x2d0] sm:$0x1f] }
  0x4a   :  { %235 = vst [vmem:[#allocation5 + $0x2c8] sm:$0x1f] %v110_v25  ;;  %v112_v27 = vld [vmem:[#allocation2 + $0x2d8] sm:$0x1f]  ;;  %v113_v28 = vld [vmem:[#allocation2 + $0x2e0] sm:$0x1f] }
  0x4b   :  { %236 = vst [vmem:[#allocation5 + $0x2d0] sm:$0x1f] %v111_v26  ;;  %237 = vst [vmem:[#allocation5 + $0x2d8] sm:$0x1f] %v112_v27  ;;  %v114_v29 = vld [vmem:[#allocation2 + $0x2e8] sm:$0x1f] }
  0x4c   :  { %238 = vst [vmem:[#allocation5 + $0x2e0] sm:$0x1f] %v113_v28  ;;  %v115_v30 = vld [vmem:[#allocation2 + $0x2f0] sm:$0x1f]  ;;  %v116_v31 = vld [vmem:[#allocation2 + $0x2f8] sm:$0x1f] }
  0x4d   :  { %239 = vst [vmem:[#allocation5 + $0x2e8] sm:$0x1f] %v114_v29  ;;  %240 = vst [vmem:[#allocation5 + $0x2f0] sm:$0x1f] %v115_v30  ;;  %v117_v32 = vld [vmem:[#allocation2 + $0x300] sm:$0x1f] }
  0x4e   :  { %241 = vst [vmem:[#allocation5 + $0x2f8] sm:$0x1f] %v116_v31  ;;  %v118_v33 = vld [vmem:[#allocation2 + $0x308] sm:$0x1f]  ;;  %v119_v34 = vld [vmem:[#allocation2 + $0x310] sm:$0x1f] }
  0x4f   :  { %242 = vst [vmem:[#allocation5 + $0x300] sm:$0x1f] %v117_v32  ;;  %243 = vst [vmem:[#allocation5 + $0x308] sm:$0x1f] %v118_v33  ;;  %v120_v35 = vld [vmem:[#allocation2 + $0x318] sm:$0x1f] }
  0x50   :  { %244 = vst [vmem:[#allocation5 + $0x310] sm:$0x1f] %v119_v34  ;;  %v121_v36 = vld [vmem:[#allocation2 + $0x320] sm:$0x1f]  ;;  %v122_v37 = vld [vmem:[#allocation2 + $0x328] sm:$0x1f] }
  0x51   :  { %245 = vst [vmem:[#allocation5 + $0x318] sm:$0x1f] %v120_v35  ;;  %246 = vst [vmem:[#allocation5 + $0x320] sm:$0x1f] %v121_v36  ;;  %v123_v38 = vld [vmem:[#allocation2 + $0x330] sm:$0x1f] }
  0x52   :  { %247 = vst [vmem:[#allocation5 + $0x328] sm:$0x1f] %v122_v37  ;;  %v124_v39 = vld [vmem:[#allocation2 + $0x338] sm:$0x1f]  ;;  %v125_v40 = vld [vmem:[#allocation2 + $0x340] sm:$0x1f] }
  0x53   :  { %248 = vst [vmem:[#allocation5 + $0x330] sm:$0x1f] %v123_v38  ;;  %249 = vst [vmem:[#allocation5 + $0x338] sm:$0x1f] %v124_v39  ;;  %v126_v41 = vld [vmem:[#allocation2 + $0x348] sm:$0x1f] }
  0x54   :  { %250 = vst [vmem:[#allocation5 + $0x340] sm:$0x1f] %v125_v40  ;;  %v127_v42 = vld [vmem:[#allocation2 + $0x350] sm:$0x1f]  ;;  %v128_v43 = vld [vmem:[#allocation2 + $0x358] sm:$0x1f] }
  0x55   :  { %251 = vst [vmem:[#allocation5 + $0x348] sm:$0x1f] %v126_v41  ;;  %252 = vst [vmem:[#allocation5 + $0x350] sm:$0x1f] %v127_v42  ;;  %v129_v44 = vld [vmem:[#allocation2 + $0x360] sm:$0x1f] }
  0x56   :  { %253 = vst [vmem:[#allocation5 + $0x358] sm:$0x1f] %v128_v43  ;;  %v130_v45 = vld [vmem:[#allocation2 + $0x368] sm:$0x1f]  ;;  %v131_v46 = vld [vmem:[#allocation2 + $0x370] sm:$0x1f] }
  0x57   :  { %254 = vst [vmem:[#allocation5 + $0x360] sm:$0x1f] %v129_v44  ;;  %255 = vst [vmem:[#allocation5 + $0x368] sm:$0x1f] %v130_v45  ;;  %v132_v47 = vld [vmem:[#allocation2 + $0x378] sm:$0x1f] }
  0x58   :  { %256 = vst [vmem:[#allocation5 + $0x370] sm:$0x1f] %v131_v46  ;;  %v133_v48 = vld [vmem:[#allocation2 + $0x380] sm:$0x1f]  ;;  %v134_v49 = vld [vmem:[#allocation2 + $0x388] sm:$0x1f] }
  0x59   :  { %257 = vst [vmem:[#allocation5 + $0x378] sm:$0x1f] %v132_v47  ;;  %258 = vst [vmem:[#allocation5 + $0x380] sm:$0x1f] %v133_v48  ;;  %v135_v50 = vld [vmem:[#allocation2 + $0x390] sm:$0x1f] }
  0x5a   :  { %259 = vst [vmem:[#allocation5 + $0x388] sm:$0x1f] %v134_v49  ;;  %v136_v51 = vld [vmem:[#allocation2 + $0x398] sm:$0x1f]  ;;  %v137_v52 = vld [vmem:[#allocation2 + $0x3a0] sm:$0x1f] }
  0x5b   :  { %260 = vst [vmem:[#allocation5 + $0x390] sm:$0x1f] %v135_v50  ;;  %261 = vst [vmem:[#allocation5 + $0x398] sm:$0x1f] %v136_v51  ;;  %v138_v53 = vld [vmem:[#allocation2 + $0x3a8] sm:$0x1f] }
  0x5c   :  { %262 = vst [vmem:[#allocation5 + $0x3a0] sm:$0x1f] %v137_v52  ;;  %v139_v54 = vld [vmem:[#allocation2 + $0x3b0] sm:$0x1f]  ;;  %v140_v55 = vld [vmem:[#allocation2 + $0x3b8] sm:$0x1f] }
  0x5d   :  { %263 = vst [vmem:[#allocation5 + $0x3a8] sm:$0x1f] %v138_v53  ;;  %264 = vst [vmem:[#allocation5 + $0x3b0] sm:$0x1f] %v139_v54  ;;  %v141_v56 = vld [vmem:[#allocation2 + $0x3c0] sm:$0x1f] }
  0x5e   :  { %265 = vst [vmem:[#allocation5 + $0x3b8] sm:$0x1f] %v140_v55  ;;  %v142_v57 = vld [vmem:[#allocation2 + $0x3c8] sm:$0x1f]  ;;  %v143_v58 = vld [vmem:[#allocation2 + $0x3d0] sm:$0x1f] }
  0x5f   :  { %266 = vst [vmem:[#allocation5 + $0x3c0] sm:$0x1f] %v141_v56  ;;  %267 = vst [vmem:[#allocation5 + $0x3c8] sm:$0x1f] %v142_v57  ;;  %v144_v59 = vld [vmem:[#allocation2 + $0x3d8] sm:$0x1f] }
  0x60   :  { %268 = vst [vmem:[#allocation5 + $0x3d0] sm:$0x1f] %v143_v58  ;;  %v145_v60 = vld [vmem:[#allocation2 + $0x3e0] sm:$0x1f]  ;;  %269 = vst [vmem:[#allocation5 + $0x3d8] sm:$0x1f] %v144_v59 }
  0x61   :  { %270 = vst [vmem:[#allocation5 + $0x3e0] sm:$0x1f] %v145_v60  ;;  %s308_s0 = scalar_lea.vmem %s278_s12, 16000 }
  0x62   :  { %p309_p5 = scmp.ne.s32.totalorder %s278_s12, %s308_s0  ;;  %p314_p7 = scmp.lt.s32.totalorder %s308_s0, %s308_s0 }
  0x64   :  { %p315_p8 = por %p314_p7, %p313_p6 }
  0x66   :  { %p316_p9 = pnand %p315_p8, %p309_p5 }
  0x68   :  { %319 = shalt.err (!%p316_p9)
}
  0x69   :  { %280 = dma.vmem_to_hbm [thread:$0]  %s278_s12, 16000, %s354_s1, [#allocation4]  }
  0x6a   :  { %330 = dma.done.wait [#allocation4], 16000  }
  0x6b   :  { %331 = vsyncadd [#allocation4], 4294951296 }
  0x6c   :  { %284 = vsyncpa [#allocation3], 1 }
  0x6d   :  { %285 = vsyncpa [#allocation4], 1 }

</bundles_post_ra>
